<compile_context>
chip_gen: v7x
topology: tpu7x:2x2x1
jax: 0.10.0
libtpu: 0.0.40
codegen_flags: <defaults>
</compile_context>

<pallas_src>
import jax
import jax.numpy as jnp
from jax.experimental import pallas as pl
from jax.experimental.pallas import tpu as pltpu


def _cdiv(a: int, b: int) -> int:
    return (a + b - 1) // b


def _round_up(x: int, m: int) -> int:
    return _cdiv(x, m) * m


def _padded_dim(d: int) -> int:
    # 256-aligned for the 256x256 MXUs (v6e/v7x) once D is past one slab;
    # 128-aligned otherwise (fine for the 128x128 v5e MXU and lane density).
    return _round_up(d, 256) if d > 128 else _round_up(d, 128)


def block_kernel(x_ref, w1_ref, b1_ref, w2_ref, b2_ref, o_ref, acc_ref):
    # x_ref: (tm, dp)   w1_ref: (dp, tn)  b1_ref: (1, tn)
    # w2_ref: (tn, dp)  b2_ref: (1, dp)   o_ref: (tm, dp)  acc_ref: (tm, dp) f32
    n = pl.program_id(1)

    # First Linear, column slab n of W1: native-dtype MXU operands, f32 acc.
    h = jnp.dot(x_ref[...], w1_ref[...], preferred_element_type=jnp.float32)
    h = jnp.maximum(h + b1_ref[...].astype(jnp.float32), 0.0)  # bias + ReLU (VPU)

    # Second Linear, row slab n of W2 (cast back to weight dtype keeps the
    # native bf16 MXU path for bf16 weights; no-op for f32).
    y = jnp.dot(h.astype(w2_ref.dtype), w2_ref[...],
                preferred_element_type=jnp.float32)

    @pl.when(n == 0)
    def _():
        # Seed the accumulator with residual + second bias so the final step
        # is a pure cast/store.
        acc_ref[...] = (x_ref[...].astype(jnp.float32)
                        + b2_ref[...].astype(jnp.float32))

    acc_ref[...] += y

    @pl.when(n == pl.num_programs(1) - 1)
    def _():
        o_ref[...] = acc_ref[...].astype(o_ref.dtype)


def pad_block_params(w1, b1, w2, b2):
    """Pad Block parameters once (hoisted out of the per-call path).

    w1, w2: (D, D) in (in, out) layout (== PyTorch weight.T);  b1, b2: (D,).
    Returns (w1_p, b1_p, w2_p, b2_p) with feature dim padded to dp and biases
    reshaped to (1, dp).
    """
    d = w1.shape[0]
    dp = _padded_dim(d)
    if dp != d:
        w1 = jnp.pad(w1, ((0, dp - d), (0, dp - d)))
        w2 = jnp.pad(w2, ((0, dp - d), (0, dp - d)))
        b1 = jnp.pad(b1, (0, dp - d))
        b2 = jnp.pad(b2, (0, dp - d))
    return w1, b1.reshape(1, dp), w2, b2.reshape(1, dp)


def block_forward(x, w1_p, b1_p, w2_p, b2_p, *, tm_max=512, tn=None):
    """Residual MLP block forward.  x: (B, D); params pre-padded (see above)."""
    B, D = x.shape
    dp = w1_p.shape[0]
    dtype = x.dtype
    itemsize = jnp.dtype(dtype).itemsize

    # ---- row (batch) tiling -------------------------------------------------
    # Balance tile sizes across steps (avoid padding B=tm_max+eps to 2*tm_max)
    # and use >= 2 row tiles when the batch permits so the "parallel" axis can
    # be sharded across both v7x TensorCores.
    row_tiles = max(_cdiv(B, tm_max), 2 if B >= 16 else 1)
    tm = _round_up(_cdiv(B, row_tiles), 8)
    bp = _round_up(B, tm)
    grid_rows = bp // tm

    # ---- weight (N/K) tiling ------------------------------------------------
    # Keep the weights fully VMEM-resident (tn == dp, single-buffered) while a
    # single copy of W1 + W2 fits comfortably; otherwise tile W1 columns / W2
    # rows with tn and accumulate over the (last, "arbitrary") n axis.
    if tn is None:
        resident_bytes = 2 * dp * dp * itemsize
        if resident_bytes <= 24 * 1024 * 1024:
            tn = dp
        else:
            tn = 512 if dp % 512 == 0 else 256
    assert dp % tn == 0, (dp, tn)
    n_tiles = dp // tn
    weights_invariant = (n_tiles == 1)
    # Grid-invariant blocks: single-buffer them (double-buffering an invariant
    # block only doubles its VMEM footprint).
    w_mode = pl.Buffered(1) if weights_invariant else None

    # ---- pad x only (weights were pre-padded once) --------------------------
    if (bp, dp) != (B, D):
        x_p = jnp.pad(x, ((0, bp - B), (0, dp - D)))
    else:
        x_p = x

    # ---- generation-aware VMEM budget ---------------------------------------
    wbuf = 1 if weights_invariant else 2
    est_bytes = (
        2 * tm * dp * itemsize            # x tile (double-buffered)
        + 2 * tm * dp * itemsize          # out tile (double-buffered)
        + wbuf * dp * tn * itemsize       # W1 slab
        + wbuf * tn * dp * itemsize       # W2 slab
        + wbuf * tn * itemsize            # b1 slab
        + dp * itemsize                   # b2 (single-buffered)
        + tm * dp * 4                     # f32 accumulator scratch
        + tm * (tn + dp) * 4              # f32 intermediates h, y
    )
    try:
        vmem_cap = pltpu.get_tpu_info().vmem_capacity_bytes
    except Exception:  # pragma: no cover - conservative fallback (v7x size)
        vmem_cap = 64 * 1024 * 1024
    compiler_kwargs = dict(dimension_semantics=("parallel", "arbitrary"))
    if est_bytes > 16 * 1024 * 1024:      # above the most conservative default
        compiler_kwargs["vmem_limit_bytes"] = int(
            min(est_bytes + (8 << 20), int(0.85 * vmem_cap)))

    out_p = pl.pallas_call(
        block_kernel,
        out_shape=jax.ShapeDtypeStruct((bp, dp), dtype),
        grid_spec=pltpu.PrefetchScalarGridSpec(
            num_scalar_prefetch=0,
            grid=(grid_rows, n_tiles),
            in_specs=[
                pl.BlockSpec((tm, dp), lambda i, n: (i, 0)),                     # x rows
                pl.BlockSpec((dp, tn), lambda i, n: (0, n), pipeline_mode=w_mode),  # W1[:, n]
                pl.BlockSpec((1, tn), lambda i, n: (0, n), pipeline_mode=w_mode),   # b1[n]
                pl.BlockSpec((tn, dp), lambda i, n: (n, 0), pipeline_mode=w_mode),  # W2[n, :]
                pl.BlockSpec((1, dp), lambda i, n: (0, 0),
                             pipeline_mode=pl.Buffered(1)),                         # b2
            ],
            out_specs=pl.BlockSpec((tm, dp), lambda i, n: (i, 0)),
            scratch_shapes=[pltpu.VMEM((tm, dp), jnp.float32)],
        ),
        compiler_params=pltpu.CompilerParams(**compiler_kwargs),
    )(x_p, w1_p, b1_p, w2_p, b2_p)

    if (bp, dp) != (B, D):
        out_p = out_p[:B, :D]
    return out_p


def block_reference(x, w1, b1, w2, b2):
    h = jnp.maximum(x @ w1 + b1, 0.0)
    return h @ w2 + b2 + x


def _make_params(key, d, dtype=jnp.float32):
    kw1, kb1, kw2, kb2 = jax.random.split(key, 4)
    bound = 1.0 / jnp.sqrt(d)
    w1 = jax.random.uniform(kw1, (d, d), minval=-bound, maxval=bound, dtype=dtype)
    b1 = jax.random.uniform(kb1, (d,), minval=-bound, maxval=bound, dtype=dtype)
    w2 = jax.random.uniform(kw2, (d, d), minval=-bound, maxval=bound, dtype=dtype)
    b2 = jax.random.uniform(kb2, (d,), minval=-bound, maxval=bound, dtype=dtype)
    return w1, b1, w2, b2


if __name__ == "__main__":
    key = jax.random.PRNGKey(0)
    k1, k2, k3, k4 = jax.random.split(key, 4)

    # --- test 1: module-consistent small shape (batch=8, block_dim=32) -------
    B, D = 8, 32
    x = jax.random.normal(k1, (B, D), dtype=jnp.float32)
    w1, b1, w2, b2 = _make_params(k2, D)
    params = pad_block_params(w1, b1, w2, b2)      # pad once, outside the call path
    out = jax.block_until_ready(block_forward(x, *params))
    ref = block_reference(x, w1, b1, w2, b2)
    assert out.shape == (B, D)
    assert jnp.allclose(out, ref, atol=1e-5, rtol=1e-5), "mismatch (small shape)"

    # --- test 2: exercise the N/K-tiled weight path + multi-tile batch grid --
    B2, D2 = 64, 512
    x2 = jax.random.normal(k3, (B2, D2), dtype=jnp.float32)
    w1_2, b1_2, w2_2, b2_2 = _make_params(k4, D2)
    params2 = pad_block_params(w1_2, b1_2, w2_2, b2_2)
    out2 = jax.block_until_ready(block_forward(x2, *params2, tn=256))
    ref2 = block_reference(x2, w1_2, b1_2, w2_2, b2_2)
    assert out2.shape == (B2, D2)
    assert jnp.allclose(out2, ref2, atol=2e-3, rtol=2e-3), "mismatch (tiled path)"

    print("KERNEL_OK")
</pallas_src>

<mosaic_0001>
module attributes {stable_mosaic.version = 11 : i64} {
  func.func @block_kernel(%arg0: i32, %arg1: i32, %arg2: memref<8x128xf32, #tpu.memory_space<vmem>>, %arg3: memref<128x128xf32, #tpu.memory_space<vmem>>, %arg4: memref<1x128xf32, #tpu.memory_space<vmem>>, %arg5: memref<128x128xf32, #tpu.memory_space<vmem>>, %arg6: memref<1x128xf32, #tpu.memory_space<vmem>>, %arg7: memref<8x128xf32, #tpu.memory_space<vmem>>, %arg8: memref<8x128xf32, #tpu.memory_space<vmem>>) attributes {dimension_semantics = [#tpu.dimension_semantics<parallel>, #tpu.dimension_semantics<arbitrary>], iteration_bounds = array<i64: 1, 1>, scalar_prefetch = 0 : i64, scratch_operands = 1 : i64, tpu.core_type = #tpu.core_type<tc>, window_params = [{transform_indices = @transform_0, window_bounds = array<i64: 8, 128>}, {pipeline_mode = #tpu.pipeline_mode<synchronous>, transform_indices = @transform_1, window_bounds = array<i64: 128, 128>}, {pipeline_mode = #tpu.pipeline_mode<synchronous>, transform_indices = @transform_2, window_bounds = array<i64: 1, 128>}, {pipeline_mode = #tpu.pipeline_mode<synchronous>, transform_indices = @transform_3, window_bounds = array<i64: 128, 128>}, {pipeline_mode = #tpu.pipeline_mode<synchronous>, transform_indices = @transform_4, window_bounds = array<i64: 1, 128>}, {transform_indices = @transform_5, window_bounds = array<i64: 8, 128>}]} {
    %c0 = arith.constant 0 : index
    %c0_0 = arith.constant 0 : index
    %0 = vector.load %arg2[%c0, %c0_0] : memref<8x128xf32, #tpu.memory_space<vmem>>, vector<8x128xf32>
    %c0_1 = arith.constant 0 : index
    %c0_2 = arith.constant 0 : index
    %1 = vector.load %arg3[%c0_1, %c0_2] : memref<128x128xf32, #tpu.memory_space<vmem>>, vector<128x128xf32>
    %cst = arith.constant dense<0.000000e+00> : vector<8x128xf32>
    %2 = tpu.matmul %0, %1, %cst {dimension_numbers = #tpu.dot_dimension_numbers<[1], [0], [0], [1], [0, 0, 1, 1], [], []>} : vector<8x128xf32>, vector<128x128xf32>, vector<8x128xf32> -> vector<8x128xf32>
    %c0_3 = arith.constant 0 : index
    %c0_4 = arith.constant 0 : index
    %3 = vector.load %arg4[%c0_3, %c0_4] : memref<1x128xf32, #tpu.memory_space<vmem>>, vector<1x128xf32>
    %4 = vector.broadcast %3 : vector<1x128xf32> to vector<8x128xf32>
    %5 = arith.addf %2, %4 : vector<8x128xf32>
    %cst_5 = arith.constant 0.000000e+00 : f32
    %6 = vector.broadcast %cst_5 : f32 to vector<8x128xf32>
    %7 = arith.maximumf %5, %6 : vector<8x128xf32>
    %c0_6 = arith.constant 0 : index
    %c0_7 = arith.constant 0 : index
    %8 = vector.load %arg5[%c0_6, %c0_7] : memref<128x128xf32, #tpu.memory_space<vmem>>, vector<128x128xf32>
    %cst_8 = arith.constant dense<0.000000e+00> : vector<8x128xf32>
    %9 = tpu.matmul %7, %8, %cst_8 {dimension_numbers = #tpu.dot_dimension_numbers<[1], [0], [0], [1], [0, 0, 1, 1], [], []>} : vector<8x128xf32>, vector<128x128xf32>, vector<8x128xf32> -> vector<8x128xf32>
    %c0_i32 = arith.constant 0 : i32
    %10 = arith.cmpi eq, %arg1, %c0_i32 : i32
    %11 = arith.extui %10 : i1 to i32
    %c0_i32_9 = arith.constant 0 : i32
    %12 = arith.cmpi ne, %11, %c0_i32_9 : i32
    scf.if %12 {
      %c0_16 = arith.constant 0 : index
      %c0_17 = arith.constant 0 : index
      %19 = vector.load %arg2[%c0_16, %c0_17] : memref<8x128xf32, #tpu.memory_space<vmem>>, vector<8x128xf32>
      %c0_18 = arith.constant 0 : index
      %c0_19 = arith.constant 0 : index
      %20 = vector.load %arg6[%c0_18, %c0_19] : memref<1x128xf32, #tpu.memory_space<vmem>>, vector<1x128xf32>
      %21 = vector.broadcast %20 : vector<1x128xf32> to vector<8x128xf32>
      %22 = arith.addf %19, %21 : vector<8x128xf32>
      %c0_20 = arith.constant 0 : index
      %c0_21 = arith.constant 0 : index
      %23 = vector.load %arg8[%c0_20, %c0_21] : memref<8x128xf32, #tpu.memory_space<vmem>>, vector<8x128xf32>
      tpu.vector_store %arg8[%c0_20, %c0_21], %22 {strides = array<i32>} : memref<8x128xf32, #tpu.memory_space<vmem>>, vector<8x128xf32>,
    } else {
    }
    %c0_10 = arith.constant 0 : index
    %c0_11 = arith.constant 0 : index
    %13 = vector.load %arg8[%c0_10, %c0_11] : memref<8x128xf32, #tpu.memory_space<vmem>>, vector<8x128xf32>
    %14 = arith.addf %13, %9 : vector<8x128xf32>
    %c0_12 = arith.constant 0 : index
    %c0_13 = arith.constant 0 : index
    %15 = vector.load %arg8[%c0_12, %c0_13] : memref<8x128xf32, #tpu.memory_space<vmem>>, vector<8x128xf32>
    tpu.vector_store %arg8[%c0_12, %c0_13], %14 {strides = array<i32>} : memref<8x128xf32, #tpu.memory_space<vmem>>, vector<8x128xf32>,
    %c0_i32_14 = arith.constant 0 : i32
    %16 = arith.cmpi eq, %arg1, %c0_i32_14 : i32
    %17 = arith.extui %16 : i1 to i32
    %c0_i32_15 = arith.constant 0 : i32
    %18 = arith.cmpi ne, %17, %c0_i32_15 : i32
    scf.if %18 {
      %c0_16 = arith.constant 0 : index
      %c0_17 = arith.constant 0 : index
      %19 = vector.load %arg8[%c0_16, %c0_17] : memref<8x128xf32, #tpu.memory_space<vmem>>, vector<8x128xf32>
      %c0_18 = arith.constant 0 : index
      %c0_19 = arith.constant 0 : index
      %20 = vector.load %arg7[%c0_18, %c0_19] : memref<8x128xf32, #tpu.memory_space<vmem>>, vector<8x128xf32>
      tpu.vector_store %arg7[%c0_18, %c0_19], %19 {strides = array<i32>} : memref<8x128xf32, #tpu.memory_space<vmem>>, vector<8x128xf32>,
    } else {
    }
    return
  }
  func.func @transform_0(%arg0: i32, %arg1: i32) -> (i32, i32) {
    %c0_i32 = arith.constant 0 : i32
    %c0_i32_0 = arith.constant 0 : i32
    return %arg0, %c0_i32 : i32, i32
  }
  func.func @transform_1(%arg0: i32, %arg1: i32) -> (i32, i32) {
    %c0_i32 = arith.constant 0 : i32
    %c0_i32_0 = arith.constant 0 : i32
    return %c0_i32, %arg1 : i32, i32
  }
  func.func @transform_2(%arg0: i32, %arg1: i32) -> (i32, i32) {
    %c0_i32 = arith.constant 0 : i32
    %c0_i32_0 = arith.constant 0 : i32
    return %c0_i32, %arg1 : i32, i32
  }
  func.func @transform_3(%arg0: i32, %arg1: i32) -> (i32, i32) {
    %c0_i32 = arith.constant 0 : i32
    %c0_i32_0 = arith.constant 0 : i32
    return %arg1, %c0_i32 : i32, i32
  }
  func.func @transform_4(%arg0: i32, %arg1: i32) -> (i32, i32) {
    %c0_i32 = arith.constant 0 : i32
    %c0_i32_0 = arith.constant 0 : i32
    %c0_i32_1 = arith.constant 0 : i32
    return %c0_i32, %c0_i32_0 : i32, i32
  }
  func.func @transform_5(%arg0: i32, %arg1: i32) -> (i32, i32) {
    %c0_i32 = arith.constant 0 : i32
    %c0_i32_0 = arith.constant 0 : i32
    return %arg0, %c0_i32 : i32, i32
  }
}

</mosaic_0001>

<bundles_post_ra>
// kernel: tpu_custom_call.1
= control target key start
LH: loop header
LB: loop body
LE: loop exit
PB: predicated region body
PF: predicated region fallthrough
CT: control target
= control target key end

     0   :  { %10 = vsyncpa [#allocation4], 0  ;;  %s651_s0 = inlined_call_operand.hbm [shape: f32[8,128], index: 0, kind: input, shape index: {}]   ;;  %s652_s1 = inlined_call_operand.hbm [shape: f32[128,128], index: 1, kind: input, shape index: {}]   ;;  %s653_s2 = inlined_call_operand.vmem [shape: f32[1,128], index: 2, kind: input, shape index: {}]   ;;  %s654_s3 = inlined_call_operand.hbm [shape: f32[128,128], index: 3, kind: input, shape index: {}]   ;;  %s655_s4 = inlined_call_operand.vmem [shape: f32[1,128], index: 4, kind: input, shape index: {}]   ;;  %s656_s5 = inlined_call_operand.hbm [shape: f32[8,128], index: 5, kind: output, shape index: {}]  }
   0x1   :  { %11 = vsyncpa [#allocation7], 0 }
   0x2   :  { %12 = vsyncpa [#allocation5], 0  ;;  %s536_s18 = smov [#allocation6]   ;;  %s442_s22 = scalar_lea.hbm %s652_s1, 2048 }
   0x3   :  { %s28_s19 = sshll.u32 %s536_s18, 4  ;;  %p443_p0 = scmp.ne.s32.totalorder %s652_s1, %s442_s22  ;;  %s29_s19 = int_to_ptr.vmem [resolvable:$true] %s28_s19 }
   0x4   :  { %p446_p1 = scmp.lt.u32.totalorder %s442_s22, %s652_s1 }
   0x6   :  { %p448_p2 = pnand %p446_p1, %p443_p0 }
   0x8   :  { %451 = shalt.err (!%p448_p2)
}
   0x9   :  { %s452_s27 = scalar_lea.vmem %s29_s19, 2048  ;;  %p457_p4 = scmp.lt.s32.totalorder %s29_s19, %s29_s19 }
   0xa   :  { %p453_p3 = scmp.ne.s32.totalorder %s29_s19, %s452_s27  ;;  %p458_p5 = scmp.lt.s32.totalorder %s452_s27, %s452_s27 }
   0xc   :  { %p459_p6 = por %p458_p5, %p457_p4 }
   0xe   :  { %p460_p7 = pnand %p459_p6, %p453_p3 }
  0x10   :  { %463 = shalt.err (!%p460_p7)
}
  0x11   :  { %s537_s28 = smov 128   ;;  %s538_s29 = smov 8  }
  0x12   :  { %34 = dma.hbm_to_vmem [thread:$0]  %s652_s1, 2048, %s29_s19, [#allocation7], %s537_s28, %s537_s28, %s538_s29  }
  0x13   :  { %s539_s7 = smov [#allocation3]   ;;  %s540_s9 = smov [#allocation8]  }
  0x14   :  { %s19_s8 = sshll.u32 %s539_s7, 4  ;;  %s42_s10 = sshll.u32 %s540_s9, 4  ;;  %s20_s8 = int_to_ptr.vmem [resolvable:$true] %s19_s8  ;;  %s43_s10 = int_to_ptr.vmem [resolvable:$true] %s42_s10 }
  0x15   :  { %s464_s13 = scalar_lea.hbm %s651_s0, 128 }
  0x16   :  { %p465_p8 = scmp.ne.s32.totalorder %s651_s0, %s464_s13  ;;  %p468_p9 = scmp.lt.u32.totalorder %s464_s13, %s651_s0 }
  0x18   :  { %p470_p10 = pnand %p468_p9, %p465_p8 }
  0x1a   :  { %473 = shalt.err (!%p470_p10)
}
  0x1b   :  { %s474_s1 = scalar_lea.vmem %s20_s8, 128  ;;  %p479_p12 = scmp.lt.s32.totalorder %s20_s8, %s20_s8 }
  0x1c   :  { %p475_p11 = scmp.ne.s32.totalorder %s20_s8, %s474_s1  ;;  %p480_p13 = scmp.lt.s32.totalorder %s474_s1, %s474_s1 }
  0x1e   :  { %p481_p0 = por %p480_p13, %p479_p12 }
  0x20   :  { %p482_p1 = pnand %p481_p0, %p475_p11 }
  0x22   :  { %485 = shalt.err (!%p482_p1)
}
  0x23   :  { %22 = dma.hbm_to_vmem [thread:$0]  %s651_s0, 128, %s20_s8, [#allocation4]  }
  0x24   :  { %s486_s22 = scalar_lea.hbm %s654_s3, 2048 }
  0x25   :  { %p487_p2 = scmp.ne.s32.totalorder %s654_s3, %s486_s22  ;;  %p490_p3 = scmp.lt.u32.totalorder %s486_s22, %s654_s3 }
  0x27   :  { %p492_p4 = pnand %p490_p3, %p487_p2 }
  0x29   :  { %495 = shalt.err (!%p492_p4)
}
  0x2a   :  { %s496_s27 = scalar_lea.vmem %s43_s10, 2048  ;;  %p501_p6 = scmp.lt.s32.totalorder %s43_s10, %s43_s10 }
  0x2b   :  { %p497_p5 = scmp.ne.s32.totalorder %s43_s10, %s496_s27  ;;  %p502_p7 = scmp.lt.s32.totalorder %s496_s27, %s496_s27 }
  0x2d   :  { %p503_p8 = por %p502_p7, %p501_p6 }
  0x2f   :  { %p504_p9 = pnand %p503_p8, %p497_p5 }
  0x31   :  { %507 = shalt.err (!%p504_p9)
}
  0x32   :  { %48 = dma.hbm_to_vmem [thread:$0]  %s654_s3, 2048, %s43_s10, [#allocation7], %s537_s28, %s537_s28, %s538_s29  }
  0x33   :  { %530 = dma.done.wait [#allocation4], 128  }
  0x34   :  { %531 = vsyncadd [#allocation4], 4294967168 }
  0x35   :  { %532 = dma.done.wait [#allocation7], 4096  }
  0x36   :  { %533 = vsyncadd [#allocation7], 4294963200  ;;  %v541_v0 = vmov 0.0|0.0   ;;  %vm542_vm0 = vmmov 0   ;;  %v543_v1 = vmov 0.0   ;;  %v61_v2 = vld [vmem:[#allocation6] sm:$0xff] }
  0x37   :  { %385 = vmatprep.subr.bf16.mxu0 %v541_v0  ;;  %347 = vmatprep.mubr.msk.f32.mxu0 %vm542_vm0, %v543_v1  ;;  %v62_v3 = vld [vmem:[#allocation6 + $0x8] sm:$0xff]  ;;  %v63_v4 = vld [vmem:[#allocation6 + $0x10] sm:$0xff]  ;;  %v64_v6 = vld [vmem:[#allocation6 + $0x18] sm:$0xff]  ;;  %s544_s7 = smov [#allocation9]  }
  0x38   :  { %409 = vmatprep.subr.bf16.mxu1 %v541_v0  ;;  %382 = vmatprep.mubr.msk.f32.mxu1 %vm542_vm0, %v543_v1  ;;  %v386_v5 = vpack.c.bf16 %v62_v3, %v61_v2  ;;  %v389_v7 = vpack.c.bf16 %v64_v6, %v63_v4  ;;  %v65_v8 = vld [vmem:[#allocation6 + $0x20] sm:$0xff]  ;;  %v66_v9 = vld [vmem:[#allocation6 + $0x28] sm:$0xff]  ;;  %v157_v12 = vld [vmem:[#allocation8 + $0x10] sm:$0xff]  ;;  %s269_s8 = sshll.u32 %s544_s7, 4  ;;  %s270_s8 = int_to_ptr.vmem [resolvable:$true] %s269_s8 }
  0x39   :  { %v155_v10 = vld [vmem:[#allocation8] sm:$0xff]  ;;  %v156_v11 = vld [vmem:[#allocation8 + $0x8] sm:$0xff]  ;;  %v158_v13 = vld [vmem:[#allocation8 + $0x18] sm:$0xff]  ;;  %v392_v14 = vpack.c.bf16 %v66_v9, %v65_v8  ;;  %s508_s9 = scalar_lea.vmem %s270_s8, 128  ;;  %p513_p11 = scmp.lt.s32.totalorder %s270_s8, %s270_s8 }
  0x3a   :  { %387 = vmatpush3.bf16.msra.mxu0 %v386_v5  ;;  %v410_v15 = vpack.c.bf16 %v156_v11, %v155_v10  ;;  %v67_v16 = vld [vmem:[#allocation6 + $0x30] sm:$0xff]  ;;  %v68_v17 = vld [vmem:[#allocation6 + $0x38] sm:$0xff]  ;;  %v413_v18 = vpack.c.bf16 %v158_v13, %v157_v12  ;;  %v159_v19 = vld [vmem:[#allocation8 + $0x20] sm:$0xff]  ;;  %p509_p10 = scmp.ne.s32.totalorder %s270_s8, %s508_s9  ;;  %p514_p12 = scmp.lt.s32.totalorder %s508_s9, %s508_s9 }
  0x3b   :  { %388 = vmatprep.subr.bf16.mxu0 %v541_v0  ;;  %v160_v20 = vld [vmem:[#allocation8 + $0x28] sm:$0xff]  ;;  %v395_v21 = vpack.c.bf16 %v68_v17, %v67_v16  ;;  %v69_v22 = vld [vmem:[#allocation6 + $0x40] sm:$0xff]  ;;  %v161_v25 = vld [vmem:[#allocation8 + $0x30] sm:$0xff] }
  0x3c   :  { %411 = vmatpush3.bf16.msra.mxu1 %v410_v15  ;;  %v70_v23 = vld [vmem:[#allocation6 + $0x48] sm:$0xff]  ;;  %v416_v24 = vpack.c.bf16 %v160_v20, %v159_v19  ;;  %v162_v26 = vld [vmem:[#allocation8 + $0x38] sm:$0xff]  ;;  %v71_v28 = vld [vmem:[#allocation6 + $0x50] sm:$0xff]  ;;  %p515_p13 = por %p514_p12, %p513_p11 }
  0x3d   :  { %412 = vmatprep.subr.bf16.mxu1 %v541_v0  ;;  %v398_v27 = vpack.c.bf16 %v70_v23, %v69_v22  ;;  %v72_v29 = vld [vmem:[#allocation6 + $0x58] sm:$0xff]  ;;  %v419_v30 = vpack.c.bf16 %v162_v26, %v161_v25  ;;  %v163_v31 = vld [vmem:[#allocation8 + $0x40] sm:$0xff]  ;;  %v164_v32 = vld [vmem:[#allocation8 + $0x48] sm:$0xff] }
  0x3e   :  { %390 = vmatpush3.bf16.msra.mxu0 %v389_v7  ;;  %v401_v33 = vpack.c.bf16 %v72_v29, %v71_v28  ;;  %v73_v34 = vld [vmem:[#allocation6 + $0x60] sm:$0xff]  ;;  %v74_v35 = vld [vmem:[#allocation6 + $0x68] sm:$0xff]  ;;  %v422_v36 = vpack.c.bf16 %v164_v32, %v163_v31  ;;  %v165_v37 = vld [vmem:[#allocation8 + $0x50] sm:$0xff]  ;;  %p516_p0 = pnand %p515_p13, %p509_p10 }
  0x3f   :  { %391 = vmatprep.subr.bf16.mxu0 %v541_v0  ;;  %v166_v38 = vld [vmem:[#allocation8 + $0x58] sm:$0xff]  ;;  %v404_v39 = vpack.c.bf16 %v74_v35, %v73_v34  ;;  %v75_v40 = vld [vmem:[#allocation6 + $0x70] sm:$0xff]  ;;  %v167_v43 = vld [vmem:[#allocation8 + $0x60] sm:$0xff] }
  0x40   :  { %414 = vmatpush3.bf16.msra.mxu1 %v413_v18  ;;  %v76_v41 = vld [vmem:[#allocation6 + $0x78] sm:$0xff]  ;;  %v425_v42 = vpack.c.bf16 %v166_v38, %v165_v37  ;;  %v168_v44 = vld [vmem:[#allocation8 + $0x68] sm:$0xff]  ;;  %v169_v48 = vld [vmem:[#allocation8 + $0x70] sm:$0xff] }
  0x41   :  { %415 = vmatprep.subr.bf16.mxu1 %v541_v0  ;;  %v407_v45 = vpack.c.bf16 %v76_v41, %v75_v40  ;;  %v428_v46 = vpack.c.bf16 %v168_v44, %v167_v43  ;;  %v60_v47 = vld [vmem:[#allocation3] sm:$0xff] }
  0x42   :  { %393 = vmatpush3.bf16.msra.mxu0 %v392_v14  ;;  %v170_v49 = vld [vmem:[#allocation8 + $0x78] sm:$0xff] }
  0x43   :  { %394 = vmatprep.subr.bf16.mxu0 %v541_v0  ;;  %v431_v50 = vpack.c.bf16 %v170_v49, %v169_v48  ;;  %v279_v51 = vld [vmem:[%s653_s2] ss:$0 sm:$0xff] }
  0x44   :  { %417 = vmatpush3.bf16.msra.mxu1 %v416_v24  ;;  %v280_v56 = vld [vmem:[%s655_s4] ss:$0 sm:$0xff] }
  0x45   :  { %418 = vmatprep.subr.bf16.mxu1 %v541_v0  ;;  %v253_v57 = vadd.f32 %v280_v56, %v60_v47 }
  0x46   :  { %396 = vmatpush3.bf16.msra.mxu0 %v395_v21 }
  0x47   :  { %397 = vmatprep.subr.bf16.mxu0 %v541_v0 }
  0x48   :  { %420 = vmatpush3.bf16.msra.mxu1 %v419_v30 }
  0x49   :  { %421 = vmatprep.subr.bf16.mxu1 %v541_v0 }
  0x4a   :  { %399 = vmatpush3.bf16.msra.mxu0 %v398_v27 }
  0x4b   :  { %400 = vmatprep.subr.bf16.mxu0 %v541_v0 }
  0x4c   :  { %423 = vmatpush3.bf16.msra.mxu1 %v422_v36 }
  0x4d   :  { %424 = vmatprep.subr.bf16.mxu1 %v541_v0 }
  0x4e   :  { %402 = vmatpush3.bf16.msra.mxu0 %v401_v33 }
  0x4f   :  { %403 = vmatprep.subr.bf16.mxu0 %v541_v0 }
  0x50   :  { %426 = vmatpush3.bf16.msra.mxu1 %v425_v42 }
  0x51   :  { %427 = vmatprep.subr.bf16.mxu1 %v541_v0 }
  0x52   :  { %405 = vmatpush3.bf16.msra.mxu0 %v404_v39 }
  0x53   :  { %406 = vmatprep.subr.bf16.mxu0 %v541_v0 }
  0x54   :  { %429 = vmatpush3.bf16.msra.mxu1 %v428_v46 }
  0x55   :  { %430 = vmatprep.subr.bf16.mxu1 %v541_v0 }
  0x56   :  { %408 = vmatpush3.bf16.msra.mxu0 %v407_v45 }
  0x58   :  { %432 = vmatpush3.bf16.msra.mxu1 %v431_v50 }
  0x59   :  { %348 = vmatmul.mubr.f32.vlgmr.msra.gmra.mrb[0].mxu0 %v60_v47 }
 0x12c   :  { %v150_v52 = vpop.f32.mrb[0].mxu0 }
 0x12d   :  { %v151_v53 = vadd.f32 %v279_v51, %v150_v52  ;;  %v349_v54 = vpop.f32.mrb[1].mxu0 }
 0x12f   :  { %v154_v55 = vmax.f32 %v151_v53, 0.0 }
 0x131   :  { %383 = vmatmul.mubr.f32.vlgmr.msra.gmra.mrb[0].mxu1 %v154_v55 }
 0x204   :  { %v237_v58 = vpop.f32.mrb[0].mxu1 }
 0x205   :  { %v256_v59 = vadd.f32 %v253_v57, %v237_v58  ;;  %v384_v60 = vpop.f32.mrb[1].mxu1 }
 0x207   :  { %262 = vst [vmem:[#allocation9] sm:$0xff] %v256_v59 }
 0x208   :  { %519 = shalt.err (!%p516_p0)
}
 0x209   :  { %s520_s11 = scalar_lea.hbm %s656_s5, 128 }
 0x20a   :  { %p521_p1 = scmp.ne.s32.totalorder %s656_s5, %s520_s11  ;;  %p524_p2 = scmp.lt.u32.totalorder %s520_s11, %s656_s5 }
 0x20c   :  { %p526_p3 = pnand %p524_p2, %p521_p1 }
 0x20e   :  { %529 = shalt.err (!%p526_p3)
}
 0x20f   :  { %272 = dma.vmem_to_hbm [thread:$0]  %s270_s8, 128, %s656_s5, [#allocation5]  }
 0x210   :  { %534 = dma.done.wait [#allocation5], 128  }
 0x211   :  { %535 = vsyncadd [#allocation5], 4294967168 }
 0x212   :  { %276 = vsyncpa [#allocation4], 1 }
 0x213   :  { %277 = vsyncpa [#allocation7], 1 }
 0x214   :  { %278 = vsyncpa [#allocation5], 1 }

</bundles_post_ra>
